<compile_context>
chip_gen: v5e
topology: v5e:2x2
jax: 0.10.0
libtpu: 0.0.40
codegen_flags: <defaults>
</compile_context>

<pallas_src>
import functools

import jax
import jax.numpy as jnp
from jax import lax
from jax.experimental import pallas as pl
from jax.experimental.pallas import tpu as pltpu


# ----------------------------------------------------------------------------
# In-kernel helpers
# ----------------------------------------------------------------------------
def _upsample_matrix(h, w, hs, ws, scale):
    """(h*w, hs*ws) 0/1 matrix R with R[p, v] = 1 iff the nearest-neighbour source of
    output pixel p (row-major over (h, w)) is source pixel v (row-major over (hs, ws)).
    Built from 2-D iotas (pure VPU work) so the upsample costs zero HBM traffic."""
    hw, hsws = h * w, hs * ws
    p = lax.broadcasted_iota(jnp.int32, (hw, hsws), 0)
    v = lax.broadcasted_iota(jnp.int32, (hw, hsws), 1)
    hit = ((p // w) // scale == v // ws) & ((p % w) // scale == v % ws)
    return jnp.where(hit, 1.0, 0.0).astype(jnp.float32)


def _fused_level_kernel(x_ref, src_ref, lw_ref, lb_ref, fw_ref, fb_ref,
                        out_ref, pad_ref, *, h, w, hs, ws, scale):
    """Fused per-output-level FPN pipeline for one batch element.

    x_ref:   (1, h*w, cin)     bf16  backbone feature (pixels flattened)
    src_ref: (1, hs*ws, cout)  f32   accumulated top-down lateral (coarse level)
    lw_ref:  (cin, cout) bf16, lb_ref: (1, cout) f32      -- lateral 1x1 conv
    fw_ref:  (9, cout, cout) bf16 (kh*3+kw, ci, co), fb_ref: (1, cout) f32  -- 3x3 conv
    out_ref: (1, h*w, cout) f32
    pad_ref: VMEM scratch (h+2, w+2, cout) f32 -- zero-padded combined map used as the
             in-kernel im2col source (9 shifted taps).
    """
    cout = out_ref.shape[-1]
    hw = h * w

    # Lateral 1x1 conv: bf16 MXU matmul, f32 accumulate, f32 bias.
    lat = jnp.dot(x_ref[0], lw_ref[...], preferred_element_type=jnp.float32)
    lat = lat + lb_ref[...]

    # Top-down add, nearest upsample folded in as a 0/1 replication matmul.
    rep = _upsample_matrix(h, w, hs, ws, scale)
    up = jnp.dot(rep, src_ref[0], preferred_element_type=jnp.float32)
    comb = lat + up                                           # (hw, cout) f32

    # Zero-padded VMEM slab; zero border == 'SAME' padding for the 3x3 conv.
    # (Zeroed every step: scratch may be per-core under megacore parallel split.)
    pad_ref[...] = jnp.zeros_like(pad_ref)
    pad_ref[1:h + 1, 1:w + 1, :] = comb.reshape(h, w, cout)

    # 3x3 conv = 9 shifted-tap matmuls accumulated in f32 (in-kernel im2col).
    acc = jnp.zeros((hw, cout), jnp.float32)
    for kh in range(3):
        for kw in range(3):
            tap = pad_ref[kh:kh + h, kw:kw + w, :].reshape(hw, cout)
            acc = acc + jnp.dot(tap.astype(jnp.bfloat16), fw_ref[kh * 3 + kw],
                                preferred_element_type=jnp.float32)
    out_ref[0] = (acc + fb_ref[...]).astype(out_ref.dtype)


def _lateral_kernel(x_ref, w_ref, b_ref, o_ref):
    """Plain lateral 1x1 conv (used for coarse levels that feed the top-down path)."""
    acc = jnp.dot(x_ref[0], w_ref[...], preferred_element_type=jnp.float32)
    o_ref[0] = (acc + b_ref[...]).astype(o_ref.dtype)


def _upsample_add_kernel(a_ref, src_ref, o_ref, *, h, w, hs, ws, scale):
    """a + nearest_upsample(src, scale) with the upsample as a 0/1 matmul."""
    rep = _upsample_matrix(h, w, hs, ws, scale)
    up = jnp.dot(rep, src_ref[0], preferred_element_type=jnp.float32)
    o_ref[0] = (a_ref[0] + up).astype(o_ref.dtype)


# ----------------------------------------------------------------------------
# pallas_call wrappers
# ----------------------------------------------------------------------------
def lateral_conv1x1(x_nhwc, w, b):
    """ConvModule(cin, cout, 1): per-pixel matmul, one grid step per batch element."""
    n, h, wd, cin = x_nhwc.shape
    cout = w.shape[1]
    hw = h * wd
    out = pl.pallas_call(
        _lateral_kernel,
        out_shape=jax.ShapeDtypeStruct((n, hw, cout), jnp.float32),
        grid_spec=pltpu.PrefetchScalarGridSpec(
            num_scalar_prefetch=0,
            grid=(n,),
            in_specs=[
                pl.BlockSpec((1, hw, cin), lambda i: (i, 0, 0)),
                pl.BlockSpec((cin, cout), lambda i: (0, 0)),
                pl.BlockSpec((1, cout), lambda i: (0, 0)),
            ],
            out_specs=pl.BlockSpec((1, hw, cout), lambda i: (i, 0, 0)),
        ),
        compiler_params=pltpu.CompilerParams(dimension_semantics=("parallel",)),
    )(x_nhwc.reshape(n, hw, cin).astype(jnp.bfloat16),
      w.astype(jnp.bfloat16),
      b.reshape(1, cout).astype(jnp.float32))
    return out.reshape(n, h, wd, cout)


def upsample_add(a_nhwc, src_nhwc, scale):
    """a + nearest_upsample(src); only used for intermediate (non-output) top-down
    accumulations, i.e. when num_stage > 2."""
    n, h, w, c = a_nhwc.shape
    _, hs, ws, _ = src_nhwc.shape
    kernel = functools.partial(_upsample_add_kernel, h=h, w=w, hs=hs, ws=ws, scale=scale)
    out = pl.pallas_call(
        kernel,
        out_shape=jax.ShapeDtypeStruct((n, h * w, c), jnp.float32),
        grid_spec=pltpu.PrefetchScalarGridSpec(
            num_scalar_prefetch=0,
            grid=(n,),
            in_specs=[
                pl.BlockSpec((1, h * w, c), lambda i: (i, 0, 0)),
                pl.BlockSpec((1, hs * ws, c), lambda i: (i, 0, 0)),
            ],
            out_specs=pl.BlockSpec((1, h * w, c), lambda i: (i, 0, 0)),
        ),
        compiler_params=pltpu.CompilerParams(dimension_semantics=("parallel",)),
    )(a_nhwc.reshape(n, h * w, c).astype(jnp.float32),
      src_nhwc.reshape(n, hs * ws, c).astype(jnp.float32))
    return out.reshape(n, h, w, c)


def fused_output_level(x_nhwc, src_nhwc, lat_w, lat_b, fpn_w, fpn_b, scale):
    """One pallas_call per output level: conv1x1 + upsampled-add + conv3x3."""
    n, h, w, cin = x_nhwc.shape
    _, hs, ws, cout = src_nhwc.shape
    hw, hsws = h * w, hs * ws
    kernel = functools.partial(_fused_level_kernel, h=h, w=w, hs=hs, ws=ws, scale=scale)
    out = pl.pallas_call(
        kernel,
        out_shape=jax.ShapeDtypeStruct((n, hw, cout), jnp.float32),
        grid_spec=pltpu.PrefetchScalarGridSpec(
            num_scalar_prefetch=0,
            grid=(n,),                       # "parallel": v7x megacore splits batches
            in_specs=[
                pl.BlockSpec((1, hw, cin), lambda i: (i, 0, 0)),
                pl.BlockSpec((1, hsws, cout), lambda i: (i, 0, 0)),
                pl.BlockSpec((cin, cout), lambda i: (0, 0)),
                pl.BlockSpec((1, cout), lambda i: (0, 0)),
                pl.BlockSpec((9, cout, cout), lambda i: (0, 0, 0)),
                pl.BlockSpec((1, cout), lambda i: (0, 0)),
            ],
            out_specs=pl.BlockSpec((1, hw, cout), lambda i: (i, 0, 0)),
            scratch_shapes=[pltpu.VMEM((h + 2, w + 2, cout), jnp.float32)],
        ),
        # Tiles are tiny here; raise vmem_limit_bytes when moving to production sizes.
        compiler_params=pltpu.CompilerParams(dimension_semantics=("parallel",)),
    )(x_nhwc.reshape(n, hw, cin).astype(jnp.bfloat16),
      src_nhwc.reshape(n, hsws, cout).astype(jnp.float32),
      lat_w.astype(jnp.bfloat16),
      lat_b.reshape(1, cout).astype(jnp.float32),
      fpn_w.reshape(9, cout, cout).astype(jnp.bfloat16),
      fpn_b.reshape(1, cout).astype(jnp.float32))
    return out.reshape(n, h, w, cout)


# ----------------------------------------------------------------------------
# pinkFPN forward (mirrors the PyTorch module's forward)
# ----------------------------------------------------------------------------
class _LazyLateral:
    """Deferred output lateral: its conv1x1(x) [+ up(src)] is fused with the 3x3 conv.
    Output laterals are never top-down sources, so they never need materialization."""

    def __init__(self, x_nhwc, lat_w, lat_b):
        self.x = x_nhwc
        self.lat_w = lat_w
        self.lat_b = lat_b
        self.src = None
        self.scale = None

    @property
    def shape(self):
        n, h, w, _ = self.x.shape
        return (n, h, w, self.lat_w.shape[1])


def _add_topdown(dst, src):
    """Mirror of: next = F.interpolate(src, scale, 'nearest'); crop; dst = dst + next.
    `dst` may be lazy (deferred into the fused kernel) or concrete; `src` is concrete."""
    assert not isinstance(src, _LazyLateral)
    dh, dw = dst.shape[1], dst.shape[2]
    sh, sw = src.shape[1], src.shape[2]
    # TODO(synk): fractional nearest scale factors unsupported (FPN pyramids are exact
    # power-of-two ratios); scale derives from the W ratio like the PyTorch module.
    scale = dw // sw
    h, w = min(sh * scale, dh), min(sw * scale, dw)
    if isinstance(dst, _LazyLateral):
        assert dst.src is None, "output lateral receives at most one top-down add"
        if (h, w) != (dh, dw):
            dst.x = dst.x[:, :h, :w, :]
        dst.src = src
        dst.scale = scale
        return dst
    a = dst if (h, w) == (dh, dw) else dst[:, :h, :w, :]
    return upsample_add(a, src, scale)


def pink_fpn_forward(inputs_nchw, params, *, num_stage, num_outs,
                     start_level=0, add_extra_convs=False):
    num_ins = len(inputs_nchw)
    assert num_ins == num_stage * (num_stage + 1) // 2

    # NCHW (PyTorch contract) -> NHWC once at the boundary.
    inputs = [jnp.transpose(x, (0, 2, 3, 1)) for x in inputs_nchw]

    n_lats = num_ins - start_level
    laterals = []
    for i in range(n_lats):
        x = inputs[i + start_level]
        if i < 2:
            # path_outs[0] / path_outs[1] (the only levels reaching an fpn conv) are
            # always laterals[0] / laterals[1]; defer their 1x1 conv so it fuses with
            # the top-down add and the 3x3 conv in a single kernel.
            laterals.append(_LazyLateral(x, params["lat_w"][i], params["lat_b"][i]))
        else:
            laterals.append(lateral_conv1x1(x, params["lat_w"][i], params["lat_b"][i]))

    reshaped_laterals = [[] for _ in range(n_lats)]
    idx = 0
    for i in range(num_stage):
        num = num_stage - i
        for j in range(i, i + num):
            reshaped_laterals[j].append(laterals[idx])
            idx += 1

    used_backbone_levels = None
    for idx_bran in range(num_stage - 1, 0, -1):
        lats = reshaped_laterals[idx_bran]
        used_backbone_levels = len(lats)
        for i in range(used_backbone_levels - 1, 0, -1):
            lats[i - 1] = _add_topdown(lats[i - 1], lats[i])
        if idx_bran != 0:
            branch = reshaped_laterals[idx_bran - 1]
            branch[-1] = _add_topdown(branch[-1], lats[-1])

    path_outs = []
    for i in range(num_stage):
        num = num_stage - i
        for j in range(i, i + num):
            path_outs.append(reshaped_laterals[j][i])

    outs = []
    for i in range(used_backbone_levels):
        lazy = path_outs[i]
        assert isinstance(lazy, _LazyLateral) and lazy.src is not None
        outs.append(fused_output_level(lazy.x, lazy.src, lazy.lat_w, lazy.lat_b,
                                       params["fpn_w"][i], params["fpn_b"][i],
                                       lazy.scale))

    if num_outs > len(outs):
        if not add_extra_convs:
            for _ in range(num_outs - used_backbone_levels):
                # TODO(synk): max_pool2d(kernel=1, stride=2) is a stride-2 subsample;
                # kept as XLA slicing glue (could be folded into a BlockSpec index_map).
                outs.append(outs[-1][:, ::2, ::2, :])
        # TODO(synk): add_extra_convs branch not exercised in this synthetic config.

    # NHWC -> NCHW at the boundary to match the PyTorch module's output layout.
    return tuple(jnp.transpose(o, (0, 3, 1, 2)) for o in outs)


# ----------------------------------------------------------------------------
# Pure-XLA reference (same bf16/f32 recipe) for a self-check
# ----------------------------------------------------------------------------
def _ref_pink_fpn(inputs_nchw, params, *, num_stage, num_outs):
    f32, bf16 = jnp.float32, jnp.bfloat16

    def conv1x1(x, wt, b):
        y = jnp.einsum("nhwc,cd->nhwd", x.astype(bf16), wt.astype(bf16),
                       preferred_element_type=f32)
        return y + b

    def conv3x3(x, wt, b):
        y = lax.conv_general_dilated(x.astype(bf16), wt.astype(bf16), (1, 1), "SAME",
                                     dimension_numbers=("NHWC", "HWIO", "NHWC"),
                                     preferred_element_type=f32)
        return y + b

    def up(x, s):
        return jnp.repeat(jnp.repeat(x, s, axis=1), s, axis=2)

    xs = [jnp.transpose(x, (0, 2, 3, 1)) for x in inputs_nchw]
    lats_all = [conv1x1(xs[i], params["lat_w"][i], params["lat_b"][i])
                for i in range(len(xs))]
    reshaped = [[] for _ in lats_all]
    idx = 0
    for i in range(num_stage):
        for j in range(i, num_stage):
            reshaped[j].append(lats_all[idx])
            idx += 1
    used = None
    for idx_bran in range(num_stage - 1, 0, -1):
        lats = reshaped[idx_bran]
        used = len(lats)
        for i in range(used - 1, 0, -1):
            s = lats[i - 1].shape[2] // lats[i].shape[2]
            nxt = up(lats[i], s)
            h = min(nxt.shape[1], lats[i - 1].shape[1])
            w = min(nxt.shape[2], lats[i - 1].shape[2])
            lats[i - 1] = lats[i - 1][:, :h, :w, :] + nxt[:, :h, :w, :]
        if idx_bran != 0:
            big = reshaped[idx_bran - 1][-1]
            small = lats[-1]
            s = big.shape[2] // small.shape[2]
            nxt = up(small, s)
            h = min(nxt.shape[1], big.shape[1])
            w = min(nxt.shape[2], big.shape[2])
            reshaped[idx_bran - 1][-1] = big[:, :h, :w, :] + nxt[:, :h, :w, :]
    path_outs = []
    for i in range(num_stage):
        for j in range(i, num_stage):
            path_outs.append(reshaped[j][i])
    outs = [conv3x3(path_outs[i], params["fpn_w"][i], params["fpn_b"][i])
            for i in range(used)]
    for _ in range(num_outs - used):
        outs.append(outs[-1][:, ::2, ::2, :])
    return tuple(jnp.transpose(o, (0, 3, 1, 2)) for o in outs)


if __name__ == "__main__":
    key = jax.random.PRNGKey(0)
    num_stage = 2                  # => num_stage*(num_stage+1)//2 = 3 backbone inputs
    in_channels = [4, 8, 16]
    out_channels = 16
    num_outs = 3
    batch = 2
    spatial = [16, 8, 4]

    k_in, k_par = jax.random.split(key)
    kin = jax.random.split(k_in, len(in_channels))
    inputs = [
        jax.random.normal(kin[i], (batch, in_channels[i], spatial[i], spatial[i]),
                          jnp.float32)
        for i in range(len(in_channels))
    ]

    # Deterministic synthetic parameters (lateral 1x1 convs + fpn 3x3 convs, HWIO).
    params = {"lat_w": [], "lat_b": [], "fpn_w": [], "fpn_b": []}
    kpar = jax.random.split(k_par, 4 * len(in_channels))
    for i, cin in enumerate(in_channels):
        params["lat_w"].append(
            0.05 * jax.random.normal(kpar[4 * i], (cin, out_channels), jnp.float32))
        params["lat_b"].append(
            0.01 * jax.random.normal(kpar[4 * i + 1], (out_channels,), jnp.float32))
        params["fpn_w"].append(
            0.05 * jax.random.normal(kpar[4 * i + 2],
                                     (3, 3, out_channels, out_channels), jnp.float32))
        params["fpn_b"].append(
            0.01 * jax.random.normal(kpar[4 * i + 3], (out_channels,), jnp.float32))

    outs = pink_fpn_forward(inputs, params, num_stage=num_stage, num_outs=num_outs)
    for o in outs:
        jax.block_until_ready(o)

    refs = _ref_pink_fpn(inputs, params, num_stage=num_stage, num_outs=num_outs)
    assert len(outs) == len(refs)
    for got, ref in zip(outs, refs):
        assert got.shape == ref.shape, (got.shape, ref.shape)
        assert jnp.allclose(got, ref, atol=1e-2, rtol=1e-2), \
            float(jnp.max(jnp.abs(got - ref)))

    print("KERNEL_OK")
</pallas_src>

<mosaic_0001>
module attributes {stable_mosaic.version = 11 : i64} {
  func.func @_lateral_kernel(%arg0: i32, %arg1: memref<1x16x16xbf16, #tpu.memory_space<vmem>>, %arg2: memref<16x16xbf16, #tpu.memory_space<vmem>>, %arg3: memref<1x16xf32, #tpu.memory_space<vmem>>, %arg4: memref<1x16x16xf32, #tpu.memory_space<vmem>>) attributes {dimension_semantics = [#tpu.dimension_semantics<parallel>], iteration_bounds = array<i64: 2>, scalar_prefetch = 0 : i64, scratch_operands = 0 : i64, tpu.core_type = #tpu.core_type<tc>, window_params = [{transform_indices = @transform_0, window_bounds = array<i64: 1, 16, 16>}, {pipeline_mode = #tpu.pipeline_mode<synchronous>, transform_indices = @transform_1, window_bounds = array<i64: 16, 16>}, {pipeline_mode = #tpu.pipeline_mode<synchronous>, transform_indices = @transform_2, window_bounds = array<i64: 1, 16>}, {transform_indices = @transform_3, window_bounds = array<i64: 1, 16, 16>}]} {
    %c0 = arith.constant 0 : index
    %c0_0 = arith.constant 0 : index
    %c0_1 = arith.constant 0 : index
    %0 = vector.load %arg1[%c0, %c0_0, %c0_1] : memref<1x16x16xbf16, #tpu.memory_space<vmem>>, vector<1x16x16xbf16>
    %1 = vector.shape_cast %0 : vector<1x16x16xbf16> to vector<16x16xbf16>
    %c0_2 = arith.constant 0 : index
    %c0_3 = arith.constant 0 : index
    %2 = vector.load %arg2[%c0_2, %c0_3] : memref<16x16xbf16, #tpu.memory_space<vmem>>, vector<16x16xbf16>
    %cst = arith.constant dense<0.000000e+00> : vector<16x16xf32>
    %3 = tpu.matmul %1, %2, %cst {dimension_numbers = #tpu.dot_dimension_numbers<[1], [0], [0], [1], [0, 0, 1, 1], [], []>} : vector<16x16xbf16>, vector<16x16xbf16>, vector<16x16xf32> -> vector<16x16xf32>
    %c0_4 = arith.constant 0 : index
    %c0_5 = arith.constant 0 : index
    %4 = vector.load %arg3[%c0_4, %c0_5] : memref<1x16xf32, #tpu.memory_space<vmem>>, vector<1x16xf32>
    %5 = vector.broadcast %4 : vector<1x16xf32> to vector<16x16xf32>
    %6 = arith.addf %3, %5 : vector<16x16xf32>
    %c0_6 = arith.constant 0 : index
    %c0_7 = arith.constant 0 : index
    %c0_8 = arith.constant 0 : index
    %7 = vector.load %arg4[%c0_6, %c0_7, %c0_8] : memref<1x16x16xf32, #tpu.memory_space<vmem>>, vector<1x16x16xf32>
    %8 = vector.shape_cast %7 : vector<1x16x16xf32> to vector<16x16xf32>
    %9 = vector.shape_cast %6 : vector<16x16xf32> to vector<1x16x16xf32>
    tpu.vector_store %arg4[%c0_6, %c0_7, %c0_8], %9 {strides = array<i32>} : memref<1x16x16xf32, #tpu.memory_space<vmem>>, vector<1x16x16xf32>,
    return
  }
  func.func @transform_0(%arg0: i32) -> (i32, i32, i32) {
    %c0_i32 = arith.constant 0 : i32
    %c0_i32_0 = arith.constant 0 : i32
    %c0_i32_1 = arith.constant 0 : i32
    return %arg0, %c0_i32, %c0_i32_0 : i32, i32, i32
  }
  func.func @transform_1(%arg0: i32) -> (i32, i32) {
    %c0_i32 = arith.constant 0 : i32
    %c0_i32_0 = arith.constant 0 : i32
    %c0_i32_1 = arith.constant 0 : i32
    return %c0_i32, %c0_i32_0 : i32, i32
  }
  func.func @transform_2(%arg0: i32) -> (i32, i32) {
    %c0_i32 = arith.constant 0 : i32
    %c0_i32_0 = arith.constant 0 : i32
    %c0_i32_1 = arith.constant 0 : i32
    return %c0_i32, %c0_i32_0 : i32, i32
  }
  func.func @transform_3(%arg0: i32) -> (i32, i32, i32) {
    %c0_i32 = arith.constant 0 : i32
    %c0_i32_0 = arith.constant 0 : i32
    %c0_i32_1 = arith.constant 0 : i32
    return %arg0, %c0_i32, %c0_i32_0 : i32, i32, i32
  }
}

</mosaic_0001>

<bundles_post_ra>
// kernel: tpu_custom_call.1
= control target key start
LH: loop header
LB: loop body
LE: loop exit
PB: predicated region body
PF: predicated region fallthrough
CT: control target
= control target key end

     0   :  { %8 = vsyncpa [#allocation3], 0  ;;  %s746_s0 = inlined_call_operand.hbm [shape: bf16[2,16,16], index: 0, kind: input, shape index: {}]   ;;  %s747_s1 = inlined_call_operand.hbm [shape: bf16[16,16], index: 1, kind: input, shape index: {}]   ;;  %s748_s2 = inlined_call_operand.vmem [shape: f32[1,16], index: 2, kind: input, shape index: {}]   ;;  %s749_s3 = inlined_call_operand.hbm [shape: f32[2,16,16], index: 3, kind: output, shape index: {}]  }
   0x1   :  { %10 = vsyncpa [#allocation3 + $0x1], 0 }
   0x2   :  { %11 = vsyncpa [#allocation6], 0 }
   0x3   :  { %12 = vsyncpa [#allocation4], 0 }
   0x4   :  { %14 = vsyncpa [#allocation4 + $0x1], 0  ;;  %s595_s12 = smov 0   ;;  %s597_s13 = smov 0  }
   0x5   :  { %s599_s14 = smov 0   ;;  %s601_s15 = smov 0  }
   0x6 LB: > { %s616_s16 = sadd.s32 4294967295, %s568_s15   ;;  %s347_s17 = sadd.s32 4294967294, %s568_s15   ;;  %s568_s15 = sphi %s601_s15, %s759_s15   ;;  %s564_s14 = sphi %s599_s14, %s758_s14   ;;  %s560_s13 = sphi %s597_s13, %s757_s13   ;;  %s556_s12 = sphi %s595_s12, %s756_s12  }
   0x7   : > { %p40_p0 = scmp.ne.s32.totalorder %s560_s13, %s556_s12  ;;  %p41_p1 = scmp.eq.s32.totalorder %s616_s16, 0 }
   0x8   : > { %p106_p2 = scmp.eq.s32.totalorder %s616_s16, 1  ;;  %p112_p3 = scmp.eq.s32.totalorder %s347_s17, 1 }
   0x9   : > { %p625_p4 = por %p41_p1, %p40_p0  ;;  %p348_p5 = scmp.ge.s32.totalorder %s568_s15, 1 }
   0xa   : > { %p630_p6 = por %p112_p3, %p40_p0  ;;  %p119_p7 = scmp.lt.s32.totalorder %s568_s15, 3 }
   0xb   : > { %s130_s22 = sshll.u32 %s747_s1, 4  ;;  %s570_s24 = smov [#allocation5]   ;;  %s131_s22 = int_to_ptr.hbm [resolvable:$true] %s130_s22 }
   0xc   : > { %p638_p8 = pnand %p348_p5, %p119_p7  ;;  %s132_s25 = sshll.u32 %s570_s24, 4  ;;  %s133_s25 = int_to_ptr.vmem [resolvable:$true] %s132_s25 }
   0xd   : > { %s648_s26 = sadd.s32 1, %s568_s15   ;;  %s571_s27 = smov 64  }
   0xe   : > { %p384_p9 = pneg %p638_p8  ;;  %s572_s28 = smov 4  }
   0xf   : > { %s24_s29 = ssub.s32 %s568_s15, %s648_s26  ;;  %s27_s30 = sadd.s32 1, %s564_s14 }
  0x10   : > { %p385_p10 = pnand %p384_p9, %p41_p1  ;;  %p25_p12 = scmp.eq.s32.totalorder %s24_s29, 0 }
  0x11   : > { %p34_p13 = scmp.ne.s32.totalorder %s564_s14, %s560_s13  ;;  %p35_p0 = scmp.eq.s32.totalorder %s568_s15, 0 }
  0x12   : > { %387 = dma.hbm_to_vmem [thread:$0]  (!%p385_p10), %s131_s22, 128, %s133_s25, [#allocation6], %s571_s27, %s571_s27, %s572_s28  }
  0x13   : > { %s660_s4 = scalar_select %p25_p12, %s564_s14, %s27_s30  }
  0x14   : > { %p664_p3 = por %p106_p2, %p34_p13  ;;  %p397_p5 = scmp.lt.s32.totalorder %s568_s15, 2 }
  0x15   : > { %s149_s6 = sand.u32 1, %s564_s14   ;;  %s372_s7 = sshll.u32 %s568_s15, 3 }
  0x16   : > { %p36_p7 = por %p35_p0, %p34_p13  ;;  %s351_s8 = sshll.u32 %s149_s6, 3 }
  0x17   : > { %s158_s11 = scalar_lea.hbm %s746_s0, %s372_s7  ;;  %s153_s20 = scalar_lea.vmem [#allocation2], %s351_s8 }
  0x18   : > { %s159_s17 = sshll.u32 %s158_s11, 4  ;;  %s161_s21 = sshll.u32 %s153_s20, 4  ;;  %s160_s17 = int_to_ptr.hbm [resolvable:$true] %s159_s17  ;;  %s162_s21 = int_to_ptr.vmem [resolvable:$true] %s161_s21 }
  0x19   : > { %p674_p9 = pnand %p397_p5, %p36_p7  ;;  %s150_s24 = scalar_lea.sflag [#allocation3], %s149_s6 }
  0x1a   : > { %s468_s25 = sshra.s32 %s160_s17, 4  ;;  %s475_s8 = scalar_lea.hbm %s746_s0, 16  ;;  %s469_s25 = int_to_ptr.hbm [resolvable:$true] %s468_s25 }
  0x1b   : > { %s470_s29 = scalar_lea.hbm %s469_s25, 8  ;;  %p472_p10 = pneg %p674_p9 }
  0x1c   : > { %p471_p2 = scmp.ne.s32.totalorder %s469_s25, %s470_s29  ;;  %p476_p0 = scmp.lt.s32.totalorder %s469_s25, %s746_s0 }
  0x1d   : > { %p477_p5 = scmp.lt.s32.totalorder %s475_s8, %s470_s29 }
  0x1e   : > { %p473_p12 = pnand %p472_p10, %p471_p2 }
  0x1f   : > { %p478_p7 = por %p477_p5, %p476_p0 }
  0x20   : > { %p474_p13 = pneg %p473_p12 }
  0x22   : > { %p479_p11 = pnand %p478_p7, %p474_p13 }
  0x24   : > { %482 = shalt.err (!%p479_p11)
}
  0x25   : > { %391 = dma.hbm_to_vmem [thread:$0]  (!%p674_p9), %s160_s17, 128, %s162_s21, %s150_s24, %s571_s27, %s571_s27, %s572_s28  }
  0x26   : > { %173 = sbr.rel (%p638_p8) target bundleno = 190 (0xbe), region = 32  ;;  %s694_s6 = sand.u32 (!%p638_p8), 1, %s560_s13  }
  0x27   : > { %s355_s11 = sshll.u32 (!%p638_p8), %s694_s6, 3  ;;  %s176_s20 = scalar_lea.sflag (!%p638_p8), [#allocation3], %s694_s6 }
  0x28   : > { %s179_s25 = scalar_lea.vmem (!%p638_p8), [#allocation2], %s355_s11 }
  0x2b   : > { %543 = dma.done.wait (%p625_p4), %s176_s20, 128  }
  0x2c   : > { %545 = vsyncadd (%p625_p4), %s176_s20, 4294967168 }
  0x2d   : > { %547 = dma.done.wait (%p41_p1), [#allocation6], 128  }
  0x2e   : > { %549 = vsyncadd (%p41_p1), [#allocation6], 4294967168  ;;  %v374_v0 = vld [vmem:[#allocation5] sm:$0xff]  ;;  %v373_v1 = vld [vmem:[%s179_s25] sm:$0xff]  ;;  %vm228_vm0 = vcmask 130048   ;;  %s357_s23 = sshll.u32 %s694_s6, 4 }
  0x2f   : > { %239 = vmatpush.bf16.msra.mxu0 %v374_v0  ;;  %v437_v2 = vld [vmem:[%s748_s2] ss:$0 sm:$0xff]  ;;  %s375_s18 = sshll.u32 %s616_s16, 4  ;;  %s207_s24 = scalar_lea.vmem [#allocation7], %s357_s23 }
  0x30   : > { %s260_s22 = scalar_lea.hbm %s749_s3, %s375_s18  ;;  %s261_s29 = sshll.u32 %s207_s24, 4  ;;  %s262_s29 = int_to_ptr.vmem [resolvable:$true] %s261_s29 }
  0x31   : > { %s263_s30 = sshll.u32 %s260_s22, 4  ;;  %s249_s7 = scalar_lea.sflag [#allocation4], %s694_s6  ;;  %s264_s30 = int_to_ptr.hbm [resolvable:$true] %s263_s30 }
  0x32   : > { %366 = vmatmul.msk.bf16.vlgmr.msra.gmra.mxu0 %vm228_vm0, %v373_v1  ;;  %s512_s16 = sshra.s32 %s264_s30, 4  ;;  %s518_s11 = scalar_lea.hbm %s749_s3, 32  ;;  %s513_s16 = int_to_ptr.hbm [resolvable:$true] %s512_s16 }
  0x33   : > { %s514_s8 = scalar_lea.hbm %s513_s16, 16  ;;  %p519_p11 = scmp.lt.s32.totalorder %s513_s16, %s749_s3 }
  0x34   : > { %p515_p1 = scmp.ne.s32.totalorder %s513_s16, %s514_s8  ;;  %p520_p9 = scmp.lt.s32.totalorder %s518_s11, %s514_s8 }
  0x36   : > { %p516_p4 = pnand %p515_p1, %p664_p3  ;;  %p521_p2 = por %p520_p9, %p519_p11 }
  0x38   : > { %p517_p8 = pneg %p516_p4 }
  0x3a   : > { %p522_p10 = pnand %p521_p2, %p517_p8 }
  0xaf   : > { %v241_v3 = vpop.f32.mrf.mxu0 }
  0xb0   : > { %v242_v4 = vadd.f32 %v437_v2, %v241_v3 }
  0xb2   : > { %246 = vst.msk [vmem:[%s207_s24] sm:$0xff] %vm228_vm0, %v242_v4 }
  0xb7   : > { %v243_v5 = vpop.f32.mrf.mxu0 }
  0xb8   : > { %v244_v6 = vadd.f32 %v437_v2, %v243_v5 }
  0xba   : > { %247 = vst.msk [vmem:[%s207_s24 + $0x8] sm:$0xff] %vm228_vm0, %v244_v6 }
  0xbb   : > { %525 = shalt.err (!%p522_p10)
}
  0xbc   : > { %s573_s6 = smov 128   ;;  %s574_s23 = smov 8  }
  0xbd   : > { %382 = dma.vmem_to_hbm [thread:$0]  (%p664_p3), %s262_s29, 256, %s264_s30, %s249_s7, %s573_s6, %s573_s6, %s574_s23  }
  0xbe PF: > { %s278_s27 = sand.u32 1, %s556_s12   ;;  %p755_p12 = scmp.ge.s32.totalorder %s568_s15, 2 }
  0xbf   : > { %s279_s28 = scalar_lea.sflag [#allocation4], %s278_s27 }
  0xc0   : > { %p393_p13 = pnand %p755_p12, %p630_p6 }
  0xc2   : > { %p394_p0 = pneg %p393_p13 }
  0xc4   : > { %551 = dma.done.wait (%p394_p0), %s279_s28, 256  }
  0xc5   : > { %553 = vsyncadd (%p394_p0), %s279_s28, 4294967040  ;;  %p17_p5 = scmp.ge.s32.totalorder %s648_s26, 4   ;;  %s756_s12 = smov %s560_s13 }
  0xc6   : > { %s757_s13 = smov %s564_s14  ;;  %s758_s14 = smov %s660_s4 }
  0xc7   : > { %s759_s15 = smov %s648_s26  ;;  %19 = sbr.rel (!%p17_p5) target bundleno = 6 (0x6), region = 81 }
  0xcc   :  { %285 = vsyncpa [#allocation3], 1 }
  0xcd   :  { %287 = vsyncpa [#allocation3 + $0x1], 1 }
  0xce   :  { %288 = vsyncpa [#allocation6], 1 }
  0xcf   :  { %289 = vsyncpa [#allocation4], 1 }
  0xd0   :  { %291 = vsyncpa [#allocation4 + $0x1], 1 }

</bundles_post_ra>
